<compile_context>
chip_gen: v7x
topology: tpu7x:2x2x1
jax: 0.10.0
libtpu: 0.0.40
codegen_flags: <defaults>
</compile_context>

<pallas_src>
import functools

import jax
import jax.numpy as jnp
import numpy as np
from jax.experimental import pallas as pl
from jax.experimental.pallas import tpu as pltpu

_EPS = 1e-07

_KRON_MAX_HW = 1024      # use the Kronecker-DFT path when H*W <= this
_MAX_ROW_BLOCK = 128     # images (rows) per grid step in the Kron path
_ROW_MULT = 16           # sublane-safe row-block multiple for bf16 and f32


def _round_up(x, m):
    return ((x + m - 1) // m) * m


# ---------------------------------------------------------------------------
# DFT matrices: built once in numpy and cached per (H, W)  (review item: no
# per-call jnp trig / roll retracing).
# ---------------------------------------------------------------------------
@functools.lru_cache(maxsize=None)
def _dft_1d(n):
    k = np.arange(n)
    ang = -2.0 * np.pi * np.outer(k, k) / n
    return np.exp(1j * ang) / np.sqrt(n)          # symmetric, ortho-normalized


@functools.lru_cache(maxsize=None)
def _kron_dft_shifted(h, w):
    """(Dr, Di): vec_row(fftshift_HW(fft2(X, ortho))) = vec_row(X) @ (Dr + i*Di)."""
    a = np.roll(_dft_1d(h), h // 2, axis=1)       # fftshift baked into output index
    b = np.roll(_dft_1d(w), w // 2, axis=1)
    d = np.kron(a, b)
    return (np.ascontiguousarray(d.real, dtype=np.float32),
            np.ascontiguousarray(d.imag, dtype=np.float32))


@functools.lru_cache(maxsize=None)
def _two_stage_dft_shifted(h, w):
    """A_s, B_s with fftshift_HW(fft2(X, ortho)) = A_s @ X @ B_s (complex)."""
    a = np.roll(_dft_1d(h), h // 2, axis=0)       # shift output rows
    b = np.roll(_dft_1d(w), w // 2, axis=1)       # shift output cols
    ar = np.ascontiguousarray(a.real, dtype=np.float32)
    ai = np.ascontiguousarray(a.imag, dtype=np.float32)
    br = np.ascontiguousarray(b.real, dtype=np.float32)
    bi = np.ascontiguousarray(b.imag, dtype=np.float32)
    return ar, ai, ar + ai, br, bi


def _focal_pow(sq, half_gamma):
    if half_gamma == 1.0:
        return sq
    if half_gamma == 0.5:
        return jnp.sqrt(sq)
    return jnp.exp(half_gamma * jnp.log(sq))      # sq > 0 always (eps added)


# ---------------------------------------------------------------------------
# Kernel 1: Kronecker-DFT path, one block of `block_rows` flattened images per
# grid step.  2 MXU matmuls (B, HW) @ (HW, HW); all elementwise work lane-dense.
# ---------------------------------------------------------------------------
def _make_kron_kernel(gamma, masked, nc_valid, block_rows, unmask_scale):
    half_gamma = float(gamma) * 0.5
    padded = (nc_valid % block_rows) != 0

    def _loss(x_ref, tr_ref, ti_ref, dr_ref, di_ref):
        y_r = jnp.dot(x_ref[...], dr_ref[...], preferred_element_type=jnp.float32)
        y_i = jnp.dot(x_ref[...], di_ref[...], preferred_element_type=jnp.float32)
        d_r = tr_ref[...] - y_r
        d_i = ti_ref[...] - y_i
        return _focal_pow(d_r * d_r + d_i * d_i + _EPS, half_gamma)

    if masked:
        def kernel(x_ref, tr_ref, ti_ref, w_ref, dr_ref, di_ref, out_ref):
            loss = _loss(x_ref, tr_ref, ti_ref, dr_ref, di_ref)
            # weight already folds (1 - mask) / den / (N*C); zero on padded rows.
            total = jnp.sum(loss * w_ref[...])
            out_ref[...] = jnp.broadcast_to(total, out_ref.shape)
    else:
        def kernel(x_ref, tr_ref, ti_ref, dr_ref, di_ref, out_ref):
            loss = _loss(x_ref, tr_ref, ti_ref, dr_ref, di_ref)
            if padded:                             # trace-time branch
                row0 = pl.program_id(0) * block_rows
                rid = jax.lax.broadcasted_iota(jnp.int32, loss.shape, 0) + row0
                loss = jnp.where(rid < nc_valid, loss, 0.0)
            total = jnp.sum(loss) * unmask_scale
            out_ref[...] = jnp.broadcast_to(total, out_ref.shape)

    return kernel


# ---------------------------------------------------------------------------
# Kernel 2: two-stage DFT fallback for larger images (per-image grid step),
# Karatsuba complex product -> 5 matmuls instead of 6.
# ---------------------------------------------------------------------------
def _make_two_stage_kernel(gamma, masked, unmask_scale, compute_dtype):
    half_gamma = float(gamma) * 0.5

    def _loss(x_ref, tr_ref, ti_ref, ar_ref, ai_ref, as_ref, br_ref, bi_ref):
        x = x_ref[0]                               # (H, W), real
        t_r = jnp.dot(x, br_ref[...], preferred_element_type=jnp.float32)
        t_i = jnp.dot(x, bi_ref[...], preferred_element_type=jnp.float32)
        p1 = jnp.dot(ar_ref[...], t_r.astype(compute_dtype),
                     preferred_element_type=jnp.float32)
        p2 = jnp.dot(ai_ref[...], t_i.astype(compute_dtype),
                     preferred_element_type=jnp.float32)
        p3 = jnp.dot(as_ref[...], (t_r + t_i).astype(compute_dtype),
                     preferred_element_type=jnp.float32)
        y_r = p1 - p2
        y_i = p3 - p1 - p2
        d_r = tr_ref[0] - y_r
        d_i = ti_ref[0] - y_i
        return _focal_pow(d_r * d_r + d_i * d_i + _EPS, half_gamma)

    if masked:
        def kernel(x_ref, tr_ref, ti_ref, w_ref, ar_ref, ai_ref, as_ref,
                   br_ref, bi_ref, out_ref):
            loss = _loss(x_ref, tr_ref, ti_ref, ar_ref, ai_ref, as_ref,
                         br_ref, bi_ref)
            total = jnp.sum(loss * w_ref[0])
            out_ref[...] = jnp.broadcast_to(total, out_ref.shape)
    else:
        def kernel(x_ref, tr_ref, ti_ref, ar_ref, ai_ref, as_ref,
                   br_ref, bi_ref, out_ref):
            loss = _loss(x_ref, tr_ref, ti_ref, ar_ref, ai_ref, as_ref,
                         br_ref, bi_ref)
            total = jnp.sum(loss) * unmask_scale
            out_ref[...] = jnp.broadcast_to(total, out_ref.shape)

    return kernel


def _maybe_vmem_limit(est_bytes):
    # Only raise the scoped-VMEM budget when the double-buffered working set
    # approaches the default; stay below the smallest physical VMEM (v7x 64MiB).
    if est_bytes <= 24 * 1024 * 1024:
        return None
    return int(min(est_bytes + 8 * 1024 * 1024, 56 * 1024 * 1024))


def focal_frequency_loss(preds, target_real, target_imag, mask=None, gamma=1.0,
                         use_bf16_matmul=True, force_two_stage=False):
    """Pallas TPU forward of MIFAE-Forensics FocalFrequencyLoss."""
    N, C, H, W = preds.shape
    NC, HW = N * C, H * W
    dt = jnp.bfloat16 if use_bf16_matmul else jnp.float32
    dt_bytes = jnp.dtype(dt).itemsize
    masked = mask is not None

    # torch.fft.fftshift default shifts ALL dims; roll preds for the N/C part
    # so loss row (n, c) stays aligned with target[n, c] and mask[n].
    x = jnp.roll(preds.astype(jnp.float32), (N // 2, C // 2), axis=(0, 1))

    tr = target_real.astype(jnp.float32).reshape(NC, H, W)
    ti = target_imag.astype(jnp.float32).reshape(NC, H, W)

    # Fold the whole masked reduction into per-pixel weights (hoists the
    # per-(n,c) denominator sum and divide out of the kernel).
    if masked:
        m = 1.0 - mask.astype(jnp.float32).reshape(N, H, W)
        den = jnp.sum(m, axis=(1, 2), keepdims=True)            # kept pixels per n
        wgt = jnp.broadcast_to((m / den)[:, None], (N, C, H, W)).reshape(NC, H, W)
        wgt = wgt * (1.0 / float(NC))
    unmask_scale = 1.0 / float(NC * HW)

    use_kron = (HW <= _KRON_MAX_HW) and not force_two_stage

    if use_kron:
        # ------------------ Kronecker-DFT path (small H*W) -------------------
        dr_np, di_np = _kron_dft_shifted(H, W)
        dr = jnp.asarray(dr_np, dtype=dt)
        di = jnp.asarray(di_np, dtype=dt)

        blk = min(_MAX_ROW_BLOCK, _round_up(NC, _ROW_MULT))
        nc_pad = _round_up(NC, blk)
        grid = (nc_pad // blk,)

        ops = [x.reshape(NC, HW).astype(dt), tr.reshape(NC, HW), ti.reshape(NC, HW)]
        if masked:
            ops.append(wgt.reshape(NC, HW))
        if nc_pad > NC:
            ops = [jnp.pad(a, ((0, nc_pad - NC), (0, 0))) for a in ops]

        row_spec = pl.BlockSpec((blk, HW), lambda i: (i, 0))
        mat_spec = pl.BlockSpec((HW, HW), lambda i: (0, 0))

        est = 2 * (blk * HW * (dt_bytes + 8 + (4 if masked else 0))
                   + 2 * HW * HW * dt_bytes) + 2 * 8 * 128 * 4

        partials = pl.pallas_call(
            _make_kron_kernel(gamma, masked, NC, blk, unmask_scale),
            out_shape=jax.ShapeDtypeStruct((grid[0], 8, 128), jnp.float32),
            grid_spec=pltpu.PrefetchScalarGridSpec(
                num_scalar_prefetch=0,
                grid=grid,
                in_specs=[row_spec] * len(ops) + [mat_spec, mat_spec],
                out_specs=pl.BlockSpec((1, 8, 128), lambda i: (i, 0, 0)),
            ),
            compiler_params=pltpu.CompilerParams(
                dimension_semantics=("parallel",),
                vmem_limit_bytes=_maybe_vmem_limit(est)),
        )(*ops, dr, di)
    else:
        # ------------------ two-stage DFT path (large H*W) -------------------
        # TODO(synk): for very large H/W (~1024+) the per-image working set can
        # exceed v7x's 64 MiB VMEM; spatial tiling of the DFT is not implemented.
        ar, ai, asum, br, bi = (jnp.asarray(a, dtype=dt)
                                for a in _two_stage_dft_shifted(H, W))
        ops = [x.reshape(NC, H, W).astype(dt), tr, ti]
        if masked:
            ops.append(wgt)

        img_spec = pl.BlockSpec((1, H, W), lambda i: (i, 0, 0))
        h_spec = pl.BlockSpec((H, H), lambda i: (0, 0))
        w_spec = pl.BlockSpec((W, W), lambda i: (0, 0))

        est = 2 * (H * W * (dt_bytes + 8 + (4 if masked else 0))
                   + (3 * H * H + 2 * W * W) * dt_bytes) + 2 * 8 * 128 * 4

        partials = pl.pallas_call(
            _make_two_stage_kernel(gamma, masked, unmask_scale, dt),
            out_shape=jax.ShapeDtypeStruct((NC, 8, 128), jnp.float32),
            grid_spec=pltpu.PrefetchScalarGridSpec(
                num_scalar_prefetch=0,
                grid=(NC,),
                in_specs=[img_spec] * len(ops)
                         + [h_spec, h_spec, h_spec, w_spec, w_spec],
                out_specs=pl.BlockSpec((1, 8, 128), lambda i: (i, 0, 0)),
            ),
            compiler_params=pltpu.CompilerParams(
                dimension_semantics=("parallel",),
                vmem_limit_bytes=_maybe_vmem_limit(est)),
        )(*ops, ar, ai, asum, br, bi)

    # Each grid step wrote its (already fully scaled) partial sum to its own
    # output block; the final loss is just the sum of the partials.
    return jnp.sum(partials[:, 0, 0])


def _reference(preds, target_real, target_imag, mask, gamma):
    p = jnp.fft.fft2(preds.astype(jnp.complex64), norm="ortho")
    p = jnp.fft.fftshift(p)                       # default: all axes (torch default)
    d = (target_real + 1j * target_imag) - p
    loss = jnp.power(d.real ** 2 + d.imag ** 2 + _EPS, gamma / 2.0)
    if mask is not None:
        m = 1.0 - jnp.broadcast_to(mask, preds.shape)
        l = (loss * m).sum(axis=(2, 3)) / m.sum(axis=(2, 3))
        return l.mean()
    return loss.mean()


if __name__ == "__main__":
    key = jax.random.PRNGKey(0)
    k1, k2, k3, k4 = jax.random.split(key, 4)
    N, C, H, W = 2, 4, 16, 16

    preds = jax.random.normal(k1, (N, C, H, W), jnp.float32)
    t_real = jax.random.normal(k2, (N, C, H, W), jnp.float32)
    t_imag = jax.random.normal(k3, (N, C, H, W), jnp.float32)
    mask = (jax.random.uniform(k4, (N, 1, H, W)) > 0.5).astype(jnp.float32)

    cases = {
        "kron_masked":    dict(mask=mask, gamma=1.0),
        "kron_nomask":    dict(mask=None, gamma=1.0),
        "kron_gamma2":    dict(mask=None, gamma=2.0),
        "kron_f32":       dict(mask=mask, gamma=1.0, use_bf16_matmul=False),
        "twostage_mask":  dict(mask=mask, gamma=1.0, force_two_stage=True),
        "twostage_plain": dict(mask=None, gamma=1.0, force_two_stage=True),
    }
    outs = {name: focal_frequency_loss(preds, t_real, t_imag, **kw)
            for name, kw in cases.items()}
    jax.block_until_ready(outs)

    for name, kw in cases.items():
        ref = _reference(preds, t_real, t_imag, kw["mask"], kw["gamma"])
        np.testing.assert_allclose(np.asarray(outs[name]), np.asarray(ref),
                                   rtol=2e-2, atol=1e-3, err_msg=name)
    print("KERNEL_OK")
</pallas_src>

<mosaic_0001>
module attributes {stable_mosaic.version = 11 : i64} {
  func.func @kernel(%arg0: i32, %arg1: memref<16x256xbf16, #tpu.memory_space<vmem>>, %arg2: memref<16x256xf32, #tpu.memory_space<vmem>>, %arg3: memref<16x256xf32, #tpu.memory_space<vmem>>, %arg4: memref<16x256xf32, #tpu.memory_space<vmem>>, %arg5: memref<256x256xbf16, #tpu.memory_space<vmem>>, %arg6: memref<256x256xbf16, #tpu.memory_space<vmem>>, %arg7: memref<1x8x128xf32, #tpu.memory_space<vmem>>) attributes {dimension_semantics = [#tpu.dimension_semantics<parallel>], iteration_bounds = array<i64: 1>, scalar_prefetch = 0 : i64, scratch_operands = 0 : i64, tpu.core_type = #tpu.core_type<tc>, window_params = [{transform_indices = @transform_0, window_bounds = array<i64: 16, 256>}, {transform_indices = @transform_1, window_bounds = array<i64: 16, 256>}, {transform_indices = @transform_2, window_bounds = array<i64: 16, 256>}, {transform_indices = @transform_3, window_bounds = array<i64: 16, 256>}, {pipeline_mode = #tpu.pipeline_mode<synchronous>, transform_indices = @transform_4, window_bounds = array<i64: 256, 256>}, {pipeline_mode = #tpu.pipeline_mode<synchronous>, transform_indices = @transform_5, window_bounds = array<i64: 256, 256>}, {transform_indices = @transform_6, window_bounds = array<i64: 1, 8, 128>}]} {
    %c0 = arith.constant 0 : index
    %c0_0 = arith.constant 0 : index
    %0 = vector.load %arg1[%c0, %c0_0] : memref<16x256xbf16, #tpu.memory_space<vmem>>, vector<16x256xbf16>
    %c0_1 = arith.constant 0 : index
    %c0_2 = arith.constant 0 : index
    %1 = vector.load %arg5[%c0_1, %c0_2] : memref<256x256xbf16, #tpu.memory_space<vmem>>, vector<256x256xbf16>
    %cst = arith.constant dense<0.000000e+00> : vector<16x256xf32>
    %2 = tpu.matmul %0, %1, %cst {dimension_numbers = #tpu.dot_dimension_numbers<[1], [0], [0], [1], [0, 0, 1, 1], [], []>} : vector<16x256xbf16>, vector<256x256xbf16>, vector<16x256xf32> -> vector<16x256xf32>
    %c0_3 = arith.constant 0 : index
    %c0_4 = arith.constant 0 : index
    %3 = vector.load %arg1[%c0_3, %c0_4] : memref<16x256xbf16, #tpu.memory_space<vmem>>, vector<16x256xbf16>
    %c0_5 = arith.constant 0 : index
    %c0_6 = arith.constant 0 : index
    %4 = vector.load %arg6[%c0_5, %c0_6] : memref<256x256xbf16, #tpu.memory_space<vmem>>, vector<256x256xbf16>
    %cst_7 = arith.constant dense<0.000000e+00> : vector<16x256xf32>
    %5 = tpu.matmul %3, %4, %cst_7 {dimension_numbers = #tpu.dot_dimension_numbers<[1], [0], [0], [1], [0, 0, 1, 1], [], []>} : vector<16x256xbf16>, vector<256x256xbf16>, vector<16x256xf32> -> vector<16x256xf32>
    %c0_8 = arith.constant 0 : index
    %c0_9 = arith.constant 0 : index
    %6 = vector.load %arg2[%c0_8, %c0_9] : memref<16x256xf32, #tpu.memory_space<vmem>>, vector<16x256xf32>
    %7 = arith.subf %6, %2 : vector<16x256xf32>
    %c0_10 = arith.constant 0 : index
    %c0_11 = arith.constant 0 : index
    %8 = vector.load %arg3[%c0_10, %c0_11] : memref<16x256xf32, #tpu.memory_space<vmem>>, vector<16x256xf32>
    %9 = arith.subf %8, %5 : vector<16x256xf32>
    %10 = arith.mulf %7, %7 : vector<16x256xf32>
    %11 = arith.mulf %9, %9 : vector<16x256xf32>
    %12 = arith.addf %10, %11 : vector<16x256xf32>
    %cst_12 = arith.constant 1.000000e-07 : f32
    %13 = vector.broadcast %cst_12 : f32 to vector<16x256xf32>
    %14 = arith.addf %12, %13 : vector<16x256xf32>
    %15 = math.sqrt %14 : vector<16x256xf32>
    %c0_13 = arith.constant 0 : index
    %c0_14 = arith.constant 0 : index
    %16 = vector.load %arg4[%c0_13, %c0_14] : memref<16x256xf32, #tpu.memory_space<vmem>>, vector<16x256xf32>
    %17 = arith.mulf %15, %16 : vector<16x256xf32>
    %18 = vector.shape_cast %17 : vector<16x256xf32> to vector<1x16x256xf32>
    %cst_15 = arith.constant dense<0.000000e+00> : vector<1xf32>
    %19 = vector.multi_reduction <add>, %18, %cst_15 [1, 2] : vector<1x16x256xf32> to vector<1xf32>
    %20 = vector.shape_cast %19 : vector<1xf32> to vector<1x1x1xf32>
    %21 = vector.extract %20[0, 0, 0] : f32 from vector<1x1x1xf32>
    %22 = vector.broadcast %21 : f32 to vector<1x8x128xf32>
    %c0_16 = arith.constant 0 : index
    %c0_17 = arith.constant 0 : index
    %c0_18 = arith.constant 0 : index
    %23 = vector.load %arg7[%c0_16, %c0_17, %c0_18] : memref<1x8x128xf32, #tpu.memory_space<vmem>>, vector<1x8x128xf32>
    tpu.vector_store %arg7[%c0_16, %c0_17, %c0_18], %22 {strides = array<i32>} : memref<1x8x128xf32, #tpu.memory_space<vmem>>, vector<1x8x128xf32>,
    return
  }
  func.func @transform_0(%arg0: i32) -> (i32, i32) {
    %c0_i32 = arith.constant 0 : i32
    %c0_i32_0 = arith.constant 0 : i32
    return %arg0, %c0_i32 : i32, i32
  }
  func.func @transform_1(%arg0: i32) -> (i32, i32) {
    %c0_i32 = arith.constant 0 : i32
    %c0_i32_0 = arith.constant 0 : i32
    return %arg0, %c0_i32 : i32, i32
  }
  func.func @transform_2(%arg0: i32) -> (i32, i32) {
    %c0_i32 = arith.constant 0 : i32
    %c0_i32_0 = arith.constant 0 : i32
    return %arg0, %c0_i32 : i32, i32
  }
  func.func @transform_3(%arg0: i32) -> (i32, i32) {
    %c0_i32 = arith.constant 0 : i32
    %c0_i32_0 = arith.constant 0 : i32
    return %arg0, %c0_i32 : i32, i32
  }
  func.func @transform_4(%arg0: i32) -> (i32, i32) {
    %c0_i32 = arith.constant 0 : i32
    %c0_i32_0 = arith.constant 0 : i32
    %c0_i32_1 = arith.constant 0 : i32
    return %c0_i32, %c0_i32_0 : i32, i32
  }
  func.func @transform_5(%arg0: i32) -> (i32, i32) {
    %c0_i32 = arith.constant 0 : i32
    %c0_i32_0 = arith.constant 0 : i32
    %c0_i32_1 = arith.constant 0 : i32
    return %c0_i32, %c0_i32_0 : i32, i32
  }
  func.func @transform_6(%arg0: i32) -> (i32, i32, i32) {
    %c0_i32 = arith.constant 0 : i32
    %c0_i32_0 = arith.constant 0 : i32
    %c0_i32_1 = arith.constant 0 : i32
    return %arg0, %c0_i32, %c0_i32_0 : i32, i32, i32
  }
}

</mosaic_0001>

<bundles_post_ra>
// kernel: tpu_custom_call.1
= control target key start
LH: loop header
LB: loop body
LE: loop exit
PB: predicated region body
PF: predicated region fallthrough
CT: control target
= control target key end

     0   :  { %11 = vsyncpa [#allocation3], 0  ;;  %s1186_s0 = inlined_call_operand.hbm [shape: bf16[16,256], index: 0, kind: input, shape index: {}]   ;;  %s1187_s1 = inlined_call_operand.hbm [shape: f32[16,256], index: 1, kind: input, shape index: {}]   ;;  %s1188_s2 = inlined_call_operand.hbm [shape: f32[16,256], index: 2, kind: input, shape index: {}]   ;;  %s1189_s3 = inlined_call_operand.hbm [shape: f32[16,256], index: 3, kind: input, shape index: {}]   ;;  %s1190_s4 = inlined_call_operand.hbm [shape: bf16[256,256], index: 4, kind: input, shape index: {}]   ;;  %s1191_s5 = inlined_call_operand.hbm [shape: bf16[256,256], index: 5, kind: input, shape index: {}]   ;;  %s1192_s6 = inlined_call_operand.hbm [shape: f32[1,8,128], index: 6, kind: output, shape index: {}]  }
   0x1   :  { %12 = vsyncpa [#allocation6], 0 }
   0x2   :  { %13 = vsyncpa [#allocation9], 0 }
   0x3   :  { %14 = vsyncpa [#allocation12], 0 }
   0x4   :  { %15 = vsyncpa [#allocation4], 0  ;;  %s1038_s21 = smov [#allocation5]   ;;  %s874_s25 = scalar_lea.hbm %s1187_s1, 512 }
   0x5   :  { %s33_s22 = sshll.u32 %s1038_s21, 4  ;;  %p875_p0 = scmp.ne.s32.totalorder %s1187_s1, %s874_s25  ;;  %s34_s22 = int_to_ptr.vmem [resolvable:$true] %s33_s22 }
   0x6   :  { %p878_p1 = scmp.lt.u32.totalorder %s874_s25, %s1187_s1 }
   0x8   :  { %p880_p2 = pnand %p878_p1, %p875_p0 }
   0xa   :  { %883 = shalt.err (!%p880_p2)
}
   0xb   :  { %s884_s30 = scalar_lea.vmem %s34_s22, 512  ;;  %p889_p4 = scmp.lt.s32.totalorder %s34_s22, %s34_s22 }
   0xc   :  { %p885_p3 = scmp.ne.s32.totalorder %s34_s22, %s884_s30  ;;  %p890_p5 = scmp.lt.s32.totalorder %s884_s30, %s884_s30 }
   0xe   :  { %p891_p6 = por %p890_p5, %p889_p4 }
  0x10   :  { %p892_p7 = pnand %p891_p6, %p885_p3 }
  0x12   :  { %895 = shalt.err (!%p892_p7)
}
  0x13   :  { %s1039_s7 = smov 256   ;;  %s1040_s8 = smov 16  }
  0x14   :  { %39 = dma.hbm_to_vmem [thread:$0]  %s1187_s1, 512, %s34_s22, [#allocation6], %s1039_s7, %s1039_s7, %s1040_s8  }
  0x15   :  { %s1041_s11 = smov [#allocation8]   ;;  %s1042_s13 = smov [#allocation2]  }
  0x16   :  { %s57_s12 = sshll.u32 %s1041_s11, 4  ;;  %s21_s14 = sshll.u32 %s1042_s13, 4  ;;  %s58_s12 = int_to_ptr.vmem [resolvable:$true] %s57_s12  ;;  %s22_s14 = int_to_ptr.vmem [resolvable:$true] %s21_s14 }
  0x17   :  { %s896_s17 = scalar_lea.hbm %s1189_s3, 512 }
  0x18   :  { %p897_p8 = scmp.ne.s32.totalorder %s1189_s3, %s896_s17  ;;  %p900_p9 = scmp.lt.u32.totalorder %s896_s17, %s1189_s3 }
  0x1a   :  { %p902_p10 = pnand %p900_p9, %p897_p8 }
  0x1c   :  { %905 = shalt.err (!%p902_p10)
}
  0x1d   :  { %s906_s1 = scalar_lea.vmem %s58_s12, 512  ;;  %p911_p12 = scmp.lt.s32.totalorder %s58_s12, %s58_s12 }
  0x1e   :  { %p907_p11 = scmp.ne.s32.totalorder %s58_s12, %s906_s1  ;;  %p912_p13 = scmp.lt.s32.totalorder %s906_s1, %s906_s1 }
  0x20   :  { %p913_p0 = por %p912_p13, %p911_p12 }
  0x22   :  { %p914_p1 = pnand %p913_p0, %p907_p11 }
  0x24   :  { %917 = shalt.err (!%p914_p1)
}
  0x25   :  { %63 = dma.hbm_to_vmem [thread:$0]  %s1189_s3, 512, %s58_s12, [#allocation9], %s1039_s7, %s1039_s7, %s1040_s8  }
  0x26   :  { %s918_s26 = scalar_lea.hbm %s1186_s0, 256 }
  0x27   :  { %p919_p2 = scmp.ne.s32.totalorder %s1186_s0, %s918_s26  ;;  %p922_p3 = scmp.lt.u32.totalorder %s918_s26, %s1186_s0 }
  0x29   :  { %p924_p4 = pnand %p922_p3, %p919_p2 }
  0x2b   :  { %927 = shalt.err (!%p924_p4)
}
  0x2c   :  { %s928_s9 = scalar_lea.vmem %s22_s14, 256  ;;  %p933_p6 = scmp.lt.s32.totalorder %s22_s14, %s22_s14 }
  0x2d   :  { %p929_p5 = scmp.ne.s32.totalorder %s22_s14, %s928_s9  ;;  %p934_p7 = scmp.lt.s32.totalorder %s928_s9, %s928_s9 }
  0x2f   :  { %p935_p8 = por %p934_p7, %p933_p6 }
  0x31   :  { %p936_p9 = pnand %p935_p8, %p929_p5 }
  0x33   :  { %939 = shalt.err (!%p936_p9)
}
  0x34   :  { %s1043_s3 = smov 128   ;;  %s1044_s10 = smov 8  }
  0x35   :  { %27 = dma.hbm_to_vmem [thread:$0]  %s1186_s0, 256, %s22_s14, [#allocation3], %s1043_s3, %s1043_s3, %s1044_s10  }
  0x36   :  { %s1045_s13 = smov [#allocation7]   ;;  %s1046_s16 = smov [#allocation10]  }
  0x37   :  { %s45_s15 = sshll.u32 %s1045_s13, 4  ;;  %s69_s17 = sshll.u32 %s1046_s16, 4  ;;  %s46_s15 = int_to_ptr.vmem [resolvable:$true] %s45_s15  ;;  %s70_s17 = int_to_ptr.vmem [resolvable:$true] %s69_s17 }
  0x38   :  { %s940_s20 = scalar_lea.hbm %s1188_s2, 512 }
  0x39   :  { %p941_p10 = scmp.ne.s32.totalorder %s1188_s2, %s940_s20  ;;  %p944_p11 = scmp.lt.u32.totalorder %s940_s20, %s1188_s2 }
  0x3b   :  { %p946_p12 = pnand %p944_p11, %p941_p10 }
  0x3d   :  { %949 = shalt.err (!%p946_p12)
}
  0x3e   :  { %s950_s0 = scalar_lea.vmem %s46_s15, 512  ;;  %p955_p0 = scmp.lt.s32.totalorder %s46_s15, %s46_s15 }
  0x3f   :  { %p951_p13 = scmp.ne.s32.totalorder %s46_s15, %s950_s0  ;;  %p956_p1 = scmp.lt.s32.totalorder %s950_s0, %s950_s0 }
  0x41   :  { %p957_p2 = por %p956_p1, %p955_p0 }
  0x43   :  { %p958_p3 = pnand %p957_p2, %p951_p13 }
  0x45   :  { %961 = shalt.err (!%p958_p3)
}
  0x46   :  { %51 = dma.hbm_to_vmem [thread:$0]  %s1188_s2, 512, %s46_s15, [#allocation6], %s1039_s7, %s1039_s7, %s1040_s8  }
  0x47   :  { %s962_s27 = scalar_lea.hbm %s1190_s4, 4096 }
  0x48   :  { %p963_p4 = scmp.ne.s32.totalorder %s1190_s4, %s962_s27  ;;  %p966_p5 = scmp.lt.u32.totalorder %s962_s27, %s1190_s4 }
  0x4a   :  { %p968_p6 = pnand %p966_p5, %p963_p4 }
  0x4c   :  { %971 = shalt.err (!%p968_p6)
}
  0x4d   :  { %s972_s11 = scalar_lea.vmem %s70_s17, 4096  ;;  %p977_p8 = scmp.lt.s32.totalorder %s70_s17, %s70_s17 }
  0x4e   :  { %p973_p7 = scmp.ne.s32.totalorder %s70_s17, %s972_s11  ;;  %p978_p9 = scmp.lt.s32.totalorder %s972_s11, %s972_s11 }
  0x50   :  { %p979_p10 = por %p978_p9, %p977_p8 }
  0x52   :  { %p980_p11 = pnand %p979_p10, %p973_p7 }
  0x54   :  { %983 = shalt.err (!%p980_p11)
}
  0x55   :  { %75 = dma.hbm_to_vmem [thread:$0]  %s1190_s4, 4096, %s70_s17, [#allocation9], %s1043_s3, %s1043_s3, %s1044_s10  }
  0x56   :  { %s1047_s8 = smov [#allocation11]   ;;  %s984_s16 = scalar_lea.hbm %s1191_s5, 4096 }
  0x57   :  { %s81_s12 = sshll.u32 %s1047_s8, 4  ;;  %p985_p12 = scmp.ne.s32.totalorder %s1191_s5, %s984_s16  ;;  %s82_s12 = int_to_ptr.vmem [resolvable:$true] %s81_s12 }
  0x58   :  { %p988_p13 = scmp.lt.u32.totalorder %s984_s16, %s1191_s5 }
  0x5a   :  { %p990_p0 = pnand %p988_p13, %p985_p12 }
  0x5c   :  { %993 = shalt.err (!%p990_p0)
}
  0x5d   :  { %s994_s1 = scalar_lea.vmem %s82_s12, 4096  ;;  %p999_p2 = scmp.lt.s32.totalorder %s82_s12, %s82_s12 }
  0x5e   :  { %p995_p1 = scmp.ne.s32.totalorder %s82_s12, %s994_s1  ;;  %p1000_p3 = scmp.lt.s32.totalorder %s994_s1, %s994_s1 }
  0x60   :  { %p1001_p4 = por %p1000_p3, %p999_p2 }
  0x62   :  { %p1002_p5 = pnand %p1001_p4, %p995_p1 }
  0x64   :  { %1005 = shalt.err (!%p1002_p5)
}
  0x65   :  { %87 = dma.hbm_to_vmem [thread:$0]  %s1191_s5, 4096, %s82_s12, [#allocation12], %s1043_s3, %s1043_s3, %s1044_s10  }
  0x66   :  { %1028 = dma.done.wait [#allocation3], 256  }
  0x67   :  { %1029 = vsyncadd [#allocation3], 4294967040 }
  0x68   :  { %1030 = dma.done.wait [#allocation6], 1024  }
  0x69   :  { %1031 = vsyncadd [#allocation6], 4294966272 }
  0x6a   :  { %1032 = dma.done.wait [#allocation9], 4608  }
  0x6b   :  { %1033 = vsyncadd [#allocation9], 4294962688 }
  0x6c   :  { %1034 = dma.done.wait [#allocation12], 4096  }
  0x6d   :  { %1035 = vsyncadd [#allocation12], 4294963200  ;;  %v767_v0 = vld [vmem:[#allocation10 + $0x4] ss:$8 sps:$4 sm:$0xff]   ;;  %v771_v2 = vld [vmem:[#allocation10] ss:$8 sps:$4 sm:$0xff]  }
  0x6e   :  { %v769_v1 = vld [vmem:[#allocation11 + $0x4] ss:$8 sps:$4 sm:$0xff]   ;;  %310 = vmatprep.subr.bf16.mxu0 %v767_v0  ;;  %v772_v3 = vld [vmem:[#allocation11] ss:$8 sps:$4 sm:$0xff]   ;;  %v773_v4 = vld [vmem:[#allocation10 + $0x14] ss:$8 sps:$4 sm:$0xff]  }
  0x6f   :  { %545 = vmatprep.subr.bf16.mxu1 %v769_v1  ;;  %311 = vmatpush1.bf16.msra.mxu0 %v771_v2  ;;  %v775_v5 = vld [vmem:[#allocation11 + $0x14] ss:$8 sps:$4 sm:$0xff]   ;;  %v777_v6 = vld [vmem:[#allocation10 + $0x10] ss:$8 sps:$4 sm:$0xff]   ;;  %v779_v8 = vld [vmem:[#allocation10 + $0x24] ss:$8 sps:$4 sm:$0xff]  }
  0x70   :  { %546 = vmatpush1.bf16.msra.mxu1 %v772_v3  ;;  %312 = vmatprep.subr.bf16.mxu0 %v773_v4  ;;  %v778_v7 = vld [vmem:[#allocation11 + $0x10] ss:$8 sps:$4 sm:$0xff]   ;;  %v781_v9 = vld [vmem:[#allocation11 + $0x24] ss:$8 sps:$4 sm:$0xff]   ;;  %v783_v10 = vld [vmem:[#allocation10 + $0x20] ss:$8 sps:$4 sm:$0xff]  }
  0x71   :  { %547 = vmatprep.subr.bf16.mxu1 %v775_v5  ;;  %v784_v11 = vld [vmem:[#allocation11 + $0x20] ss:$8 sps:$4 sm:$0xff]   ;;  %v785_v12 = vld [vmem:[#allocation10 + $0x34] ss:$8 sps:$4 sm:$0xff]   ;;  %v789_v14 = vld [vmem:[#allocation10 + $0x30] ss:$8 sps:$4 sm:$0xff]  }
  0x72   :  { %v787_v13 = vld [vmem:[#allocation11 + $0x34] ss:$8 sps:$4 sm:$0xff]   ;;  %v790_v15 = vld [vmem:[#allocation11 + $0x30] ss:$8 sps:$4 sm:$0xff]   ;;  %v791_v16 = vld [vmem:[#allocation10 + $0x44] ss:$8 sps:$4 sm:$0xff]  }
  0x73   :  { %313 = vmatpush1.bf16.msra.mxu0 %v777_v6  ;;  %v793_v17 = vld [vmem:[#allocation11 + $0x44] ss:$8 sps:$4 sm:$0xff]   ;;  %v795_v18 = vld [vmem:[#allocation10 + $0x40] ss:$8 sps:$4 sm:$0xff]   ;;  %v797_v20 = vld [vmem:[#allocation10 + $0x54] ss:$8 sps:$4 sm:$0xff]  }
  0x74   :  { %548 = vmatpush1.bf16.msra.mxu1 %v778_v7  ;;  %314 = vmatprep.subr.bf16.mxu0 %v779_v8  ;;  %v796_v19 = vld [vmem:[#allocation11 + $0x40] ss:$8 sps:$4 sm:$0xff]   ;;  %v799_v21 = vld [vmem:[#allocation11 + $0x54] ss:$8 sps:$4 sm:$0xff]   ;;  %v801_v22 = vld [vmem:[#allocation10 + $0x50] ss:$8 sps:$4 sm:$0xff]  }
  0x75   :  { %549 = vmatprep.subr.bf16.mxu1 %v781_v9  ;;  %v802_v23 = vld [vmem:[#allocation11 + $0x50] ss:$8 sps:$4 sm:$0xff]   ;;  %v803_v24 = vld [vmem:[#allocation10 + $0x64] ss:$8 sps:$4 sm:$0xff]   ;;  %v807_v26 = vld [vmem:[#allocation10 + $0x60] ss:$8 sps:$4 sm:$0xff]  }
  0x76   :  { %v805_v25 = vld [vmem:[#allocation11 + $0x64] ss:$8 sps:$4 sm:$0xff]   ;;  %v808_v27 = vld [vmem:[#allocation11 + $0x60] ss:$8 sps:$4 sm:$0xff]   ;;  %v809_v28 = vld [vmem:[#allocation10 + $0x74] ss:$8 sps:$4 sm:$0xff]  }
  0x77   :  { %315 = vmatpush1.bf16.msra.mxu0 %v783_v10  ;;  %v811_v29 = vld [vmem:[#allocation11 + $0x74] ss:$8 sps:$4 sm:$0xff]   ;;  %v813_v30 = vld [vmem:[#allocation10 + $0x70] ss:$8 sps:$4 sm:$0xff]   ;;  %v815_v32 = vld [vmem:[#allocation10 + $0x84] ss:$8 sps:$4 sm:$0xff]  }
  0x78   :  { %550 = vmatpush1.bf16.msra.mxu1 %v784_v11  ;;  %316 = vmatprep.subr.bf16.mxu0 %v785_v12  ;;  %v814_v31 = vld [vmem:[#allocation11 + $0x70] ss:$8 sps:$4 sm:$0xff]   ;;  %v817_v33 = vld [vmem:[#allocation11 + $0x84] ss:$8 sps:$4 sm:$0xff]   ;;  %v819_v34 = vld [vmem:[#allocation10 + $0x80] ss:$8 sps:$4 sm:$0xff]  }
  0x79   :  { %551 = vmatprep.subr.bf16.mxu1 %v787_v13  ;;  %v820_v35 = vld [vmem:[#allocation11 + $0x80] ss:$8 sps:$4 sm:$0xff]   ;;  %v821_v36 = vld [vmem:[#allocation10 + $0x94] ss:$8 sps:$4 sm:$0xff]   ;;  %v825_v38 = vld [vmem:[#allocation10 + $0x90] ss:$8 sps:$4 sm:$0xff]  }
  0x7a   :  { %v823_v37 = vld [vmem:[#allocation11 + $0x94] ss:$8 sps:$4 sm:$0xff]   ;;  %v826_v39 = vld [vmem:[#allocation11 + $0x90] ss:$8 sps:$4 sm:$0xff]   ;;  %v827_v40 = vld [vmem:[#allocation10 + $0xa4] ss:$8 sps:$4 sm:$0xff]  }
  0x7b   :  { %317 = vmatpush1.bf16.msra.mxu0 %v789_v14  ;;  %v829_v41 = vld [vmem:[#allocation11 + $0xa4] ss:$8 sps:$4 sm:$0xff]   ;;  %v831_v42 = vld [vmem:[#allocation10 + $0xa0] ss:$8 sps:$4 sm:$0xff]   ;;  %v833_v44 = vld [vmem:[#allocation10 + $0xb4] ss:$8 sps:$4 sm:$0xff]  }
  0x7c   :  { %552 = vmatpush1.bf16.msra.mxu1 %v790_v15  ;;  %318 = vmatprep.subr.bf16.mxu0 %v791_v16  ;;  %v832_v43 = vld [vmem:[#allocation11 + $0xa0] ss:$8 sps:$4 sm:$0xff]   ;;  %v835_v45 = vld [vmem:[#allocation11 + $0xb4] ss:$8 sps:$4 sm:$0xff]   ;;  %v837_v47 = vld [vmem:[#allocation10 + $0xb0] ss:$8 sps:$4 sm:$0xff]  }
  0x7d   :  { %553 = vmatprep.subr.bf16.mxu1 %v793_v17  ;;  %v865_v46 = vld [vmem:[#allocation2 + $0x4] ss:$8 sps:$4 sm:$0xff]   ;;  %v838_v48 = vld [vmem:[#allocation11 + $0xb0] ss:$8 sps:$4 sm:$0xff]   ;;  %v839_v49 = vld [vmem:[#allocation10 + $0xc4] ss:$8 sps:$4 sm:$0xff]  }
  0x7e   :  { %v841_v50 = vld [vmem:[#allocation11 + $0xc4] ss:$8 sps:$4 sm:$0xff]   ;;  %342 = vmatprep.mubr.bf16.mxu0 %v865_v46  ;;  %577 = vmatprep.mubr.bf16.mxu1 %v865_v46  ;;  %v843_v51 = vld [vmem:[#allocation10 + $0xc0] ss:$8 sps:$4 sm:$0xff]   ;;  %v845_v53 = vld [vmem:[#allocation10 + $0xd4] ss:$8 sps:$4 sm:$0xff]  }
  0x7f   :  { %319 = vmatpush1.bf16.msra.mxu0 %v795_v18  ;;  %v844_v52 = vld [vmem:[#allocation11 + $0xc0] ss:$8 sps:$4 sm:$0xff]   ;;  %v847_v54 = vld [vmem:[#allocation11 + $0xd4] ss:$8 sps:$4 sm:$0xff]   ;;  %v849_v55 = vld [vmem:[#allocation10 + $0xd0] ss:$8 sps:$4 sm:$0xff]  }
  0x80   :  { %554 = vmatpush1.bf16.msra.mxu1 %v796_v19  ;;  %320 = vmatprep.subr.bf16.mxu0 %v797_v20  ;;  %v850_v56 = vld [vmem:[#allocation11 + $0xd0] ss:$8 sps:$4 sm:$0xff]   ;;  %v851_v57 = vld [vmem:[#allocation10 + $0xe4] ss:$8 sps:$4 sm:$0xff]   ;;  %v855_v59 = vld [vmem:[#allocation10 + $0xe0] ss:$8 sps:$4 sm:$0xff]  }
  0x81   :  { %555 = vmatprep.subr.bf16.mxu1 %v799_v21  ;;  %v853_v58 = vld [vmem:[#allocation11 + $0xe4] ss:$8 sps:$4 sm:$0xff]   ;;  %v856_v60 = vld [vmem:[#allocation11 + $0xe0] ss:$8 sps:$4 sm:$0xff]   ;;  %v857_v61 = vld [vmem:[#allocation10 + $0xf4] ss:$8 sps:$4 sm:$0xff]  }
  0x82   :  { %v859_v62 = vld [vmem:[#allocation11 + $0xf4] ss:$8 sps:$4 sm:$0xff]   ;;  %v861_v63 = vld [vmem:[#allocation10 + $0xf0] ss:$8 sps:$4 sm:$0xff]   ;;  %v588_v2 = vld [vmem:[#allocation5] sm:$0xff]  ;;  %s1048_s5 = smov [#allocation13]  }
  0x83   :  { %321 = vmatpush1.bf16.msra.mxu0 %v801_v22  ;;  %v862_v0 = vld [vmem:[#allocation11 + $0xf0] ss:$8 sps:$4 sm:$0xff]   ;;  %v596_v3 = vld [vmem:[#allocation7] sm:$0xff]  ;;  %v589_v4 = vld [vmem:[#allocation5 + $0x8] sm:$0xff]  ;;  %s676_s3 = sshll.u32 %s1048_s5, 4  ;;  %s677_s3 = int_to_ptr.vmem [resolvable:$true] %s676_s3 }
  0x84   :  { %556 = vmatpush1.bf16.msra.mxu1 %v802_v23  ;;  %322 = vmatprep.subr.bf16.mxu0 %v803_v24  ;;  %v863_v1 = vld [vmem:[#allocation2] ss:$8 sps:$4 sm:$0xff]   ;;  %v597_v5 = vld [vmem:[#allocation7 + $0x8] sm:$0xff]  ;;  %s1006_s22 = scalar_lea.vmem %s677_s3, 128  ;;  %p1011_p7 = scmp.lt.s32.totalorder %s677_s3, %s677_s3 }
  0x85   :  { %557 = vmatprep.subr.bf16.mxu1 %v805_v25  ;;  %v590_v8 = vld [vmem:[#allocation5 + $0x10] sm:$0xff]  ;;  %v591_v14 = vld [vmem:[#allocation5 + $0x18] sm:$0xff]  ;;  %p1007_p6 = scmp.ne.s32.totalorder %s677_s3, %s1006_s22  ;;  %p1012_p8 = scmp.lt.s32.totalorder %s1006_s22, %s1006_s22 }
  0x86   :  { %v598_v9 = vld [vmem:[#allocation7 + $0x10] sm:$0xff]  ;;  %v599_v15 = vld [vmem:[#allocation7 + $0x18] sm:$0xff] }
  0x87   :  { %323 = vmatpush1.bf16.msra.mxu0 %v807_v26  ;;  %p1013_p9 = por %p1012_p8, %p1011_p7 }
  0x88   :  { %558 = vmatpush1.bf16.msra.mxu1 %v808_v27  ;;  %324 = vmatprep.subr.bf16.mxu0 %v809_v28 }
  0x89   :  { %559 = vmatprep.subr.bf16.mxu1 %v811_v29  ;;  %p1014_p10 = pnand %p1013_p9, %p1007_p6 }
  0x8b   :  { %325 = vmatpush1.bf16.msra.mxu0 %v813_v30 }
  0x8c   :  { %560 = vmatpush1.bf16.msra.mxu1 %v814_v31  ;;  %326 = vmatprep.subr.bf16.mxu0 %v815_v32 }
  0x8d   :  { %561 = vmatprep.subr.bf16.mxu1 %v817_v33 }
  0x8f   :  { %327 = vmatpush1.bf16.msra.mxu0 %v819_v34 }
  0x90   :  { %562 = vmatpush1.bf16.msra.mxu1 %v820_v35  ;;  %328 = vmatprep.subr.bf16.mxu0 %v821_v36 }
  0x91   :  { %563 = vmatprep.subr.bf16.mxu1 %v823_v37 }
  0x93   :  { %329 = vmatpush1.bf16.msra.mxu0 %v825_v38 }
  0x94   :  { %564 = vmatpush1.bf16.msra.mxu1 %v826_v39  ;;  %330 = vmatprep.subr.bf16.mxu0 %v827_v40 }
  0x95   :  { %565 = vmatprep.subr.bf16.mxu1 %v829_v41 }
  0x97   :  { %331 = vmatpush1.bf16.msra.mxu0 %v831_v42 }
  0x98   :  { %566 = vmatpush1.bf16.msra.mxu1 %v832_v43  ;;  %332 = vmatprep.subr.bf16.mxu0 %v833_v44 }
  0x99   :  { %567 = vmatprep.subr.bf16.mxu1 %v835_v45 }
  0x9b   :  { %333 = vmatpush1.bf16.msra.mxu0 %v837_v47 }
  0x9c   :  { %568 = vmatpush1.bf16.msra.mxu1 %v838_v48  ;;  %334 = vmatprep.subr.bf16.mxu0 %v839_v49  ;;  %v648_v49 = vld [vmem:[#allocation8] sm:$0xff] }
  0x9d   :  { %569 = vmatprep.subr.bf16.mxu1 %v841_v50 }
  0x9f   :  { %335 = vmatpush1.bf16.msra.mxu0 %v843_v51 }
  0xa0   :  { %570 = vmatpush1.bf16.msra.mxu1 %v844_v52  ;;  %336 = vmatprep.subr.bf16.mxu0 %v845_v53 }
  0xa1   :  { %571 = vmatprep.subr.bf16.mxu1 %v847_v54  ;;  %v649_v54 = vld [vmem:[#allocation8 + $0x8] sm:$0xff] }
  0xa3   :  { %337 = vmatpush1.bf16.msra.mxu0 %v849_v55 }
  0xa4   :  { %572 = vmatpush1.bf16.msra.mxu1 %v850_v56  ;;  %338 = vmatprep.subr.bf16.mxu0 %v851_v57 }
  0xa5   :  { %573 = vmatprep.subr.bf16.mxu1 %v853_v58  ;;  %v650_v58 = vld [vmem:[#allocation8 + $0x10] sm:$0xff] }
  0xa7   :  { %339 = vmatpush1.bf16.msra.mxu0 %v855_v59 }
  0xa8   :  { %574 = vmatpush1.bf16.msra.mxu1 %v856_v60  ;;  %340 = vmatprep.subr.bf16.mxu0 %v857_v61 }
  0xa9   :  { %575 = vmatprep.subr.bf16.mxu1 %v859_v62 }
  0xab   :  { %341 = vmatpush1.bf16.msra.mxu0 %v861_v63 }
  0xac   :  { %576 = vmatpush1.bf16.msra.mxu1 %v862_v0 }
  0xae   :  { %343 = vmatmul.mubr.bf16.vlgmr.msra.gmra.mrb[0].mxu0 %v863_v1 }
  0xaf   :  { %578 = vmatmul.mubr.bf16.vlgmr.msra.gmra.mrb[0].mxu1 %v863_v1 }
 0x181   :  { %v344_v6 = vpop.f32.mrb[0].mxu0 }
 0x182   :  { %v579_v7 = vpop.f32.mrb[0].mxu1  ;;  %v592_v10 = vsub.f32 %v588_v2, %v344_v6  ;;  %v346_v12 = vpop.f32.mrb[1].mxu0 }
 0x183   :  { %v600_v11 = vsub.f32 %v596_v3, %v579_v7  ;;  %v581_v13 = vpop.f32.mrb[1].mxu1  ;;  %v593_v16 = vsub.f32 %v589_v4, %v346_v12  ;;  %v348_v18 = vpop.f32.mrb[2].mxu0  ;;  %v651_v3 = vld [vmem:[#allocation8 + $0x18] sm:$0xff] }
 0x184   :  { %v601_v17 = vsub.f32 %v597_v5, %v581_v13  ;;  %v583_v19 = vpop.f32.mrb[2].mxu1  ;;  %v604_v20 = vmul.f32 %v592_v10, %v592_v10  ;;  %v594_v22 = vsub.f32 %v590_v8, %v348_v18  ;;  %v350_v24 = vpop.f32.mrb[3].mxu0 }
 0x185   :  { %v608_v21 = vmul.f32 %v600_v11, %v600_v11  ;;  %v602_v23 = vsub.f32 %v598_v9, %v583_v19  ;;  %v585_v25 = vpop.f32.mrb[3].mxu1  ;;  %v605_v26 = vmul.f32 %v593_v16, %v593_v16  ;;  %v595_v28 = vsub.f32 %v591_v14, %v350_v24 }
 0x186   :  { %v609_v27 = vmul.f32 %v601_v17, %v601_v17  ;;  %v603_v29 = vsub.f32 %v599_v15, %v585_v25  ;;  %v606_v31 = vmul.f32 %v594_v22, %v594_v22 }
 0x187   :  { %v612_v30 = vadd.f32 %v608_v21, %v604_v20  ;;  %v610_v32 = vmul.f32 %v602_v23, %v602_v23  ;;  %v607_v34 = vmul.f32 %v595_v28, %v595_v28 }
 0x188   :  { %v613_v33 = vadd.f32 %v609_v27, %v605_v26  ;;  %v611_v35 = vmul.f32 %v603_v29, %v603_v29 }
 0x189   :  { %v616_v36 = vadd.f32 1e-07, %v612_v30  ;;  %v614_v37 = vadd.f32 %v610_v32, %v606_v31 }
 0x18a   :  { %v617_v38 = vadd.f32 1e-07, %v613_v33  ;;  %v615_v39 = vadd.f32 %v611_v35, %v607_v34 }
 0x18b   :  { %866 = vrsqrt.f32 %v616_v36  ;;  %v618_v40 = vadd.f32 1e-07, %v614_v37  ;;  %vm622_vm0 = vcmp.eq.f32.partialorder %v616_v36, inf  ;;  %vm624_vm1 = vcmp.eq.f32.partialorder %v616_v36, 0.0 }
 0x18c   :  { %868 = vrsqrt.f32 %v617_v38  ;;  %v619_v41 = vadd.f32 1e-07, %v615_v39  ;;  %v625_v45 = vand.u32 2147483648, %v616_v36  ;;  %vm629_vm2 = vcmp.eq.f32.partialorder %v617_v38, inf }
 0x18d   :  { %870 = vrsqrt.f32 %v618_v40  ;;  %vm631_vm3 = vcmp.eq.f32.partialorder %v617_v38, 0.0  ;;  %v632_v48 = vand.u32 2147483648, %v617_v38  ;;  %vm636_vm4 = vcmp.eq.f32.partialorder %v618_v40, inf }
 0x18e   :  { %872 = vrsqrt.f32 %v619_v41  ;;  %vm638_vm5 = vcmp.eq.f32.partialorder %v618_v40, 0.0  ;;  %v639_v53 = vand.u32 2147483648, %v618_v40  ;;  %vm643_vm6 = vcmp.eq.f32.partialorder %v619_v41, inf }
 0x18f   :  { %v646_v61 = vand.u32 2147483648, %v619_v41  ;;  %vm645_vm7 = vcmp.eq.f32.partialorder %v619_v41, 0.0 }
 0x195   :  { %v867_v42 = vpop.eup %866 }
 0x196   :  { %v869_v43 = vpop.eup %868  ;;  %v621_v44 = vmul.f32 %v867_v42, %v616_v36 }
 0x197   :  { %v871_v46 = vpop.eup %870  ;;  %v628_v47 = vmul.f32 %v869_v43, %v617_v38 }
 0x198   :  { %v873_v50 = vpop.eup %872  ;;  %v623_v51 = vsel %vm622_vm0, %v616_v36, %v621_v44  ;;  %v635_v52 = vmul.f32 %v871_v46, %v618_v40 }
 0x199   :  { %v626_v55 = vsel %vm624_vm1, %v625_v45, %v623_v51  ;;  %v630_v56 = vsel %vm629_vm2, %v617_v38, %v628_v47  ;;  %v642_v57 = vmul.f32 %v873_v50, %v619_v41 }
 0x19a   :  { %v633_v59 = vsel %vm631_vm3, %v632_v48, %v630_v56  ;;  %v637_v60 = vsel %vm636_vm4, %v618_v40, %v635_v52  ;;  %v652_v62 = vmul.f32 %v648_v49, %v626_v55 }
 0x19b   :  { %v640_v63 = vsel %vm638_vm5, %v639_v53, %v637_v60  ;;  %v644_v0 = vsel %vm643_vm6, %v619_v41, %v642_v57  ;;  %v653_v1 = vmul.f32 %v649_v54, %v633_v59 }
 0x19c   :  { %v647_v2 = vsel %vm645_vm7, %v646_v61, %v644_v0  ;;  %v654_v4 = vmul.f32 %v650_v58, %v640_v63 }
 0x19d   :  { %v656_v5 = vadd.f32 %v653_v1, %v652_v62  ;;  %v655_v6 = vmul.f32 %v651_v3, %v647_v2 }
 0x19f   :  { %v657_v7 = vadd.f32 %v656_v5, %v654_v4 }
 0x1a1   :  { %v658_v8 = vadd.f32 %v657_v7, %v655_v6 }
 0x1a3   :  { %659 = vadd.xlane.f32.xlu0 %v658_v8 }
 0x230   :  { %v660_v9 = vpop.xlane.xlu0 %659 }
 0x231   :  { %v661_v10 = vrot.slane %v660_v9, 4 }
 0x233   :  { %v662_v11 = vadd.f32 %v661_v10, %v660_v9 }
 0x235   :  { %v663_v12 = vrot.slane %v662_v11, 2 }
 0x237   :  { %v664_v13 = vadd.f32 %v663_v12, %v662_v11 }
 0x239   :  { %v665_v14 = vrot.slane %v664_v13, 1 }
 0x23b   :  { %v666_v15 = vadd.f32 %v665_v14, %v664_v13 }
 0x23d   :  { %754 = vpush %v666_v15 }
 0x26e   :  { %s755_s10 = spop %754 }
 0x26f   :  { %v668_v16 = vstv %s755_s10 }
 0x270   :  { %669 = vst [vmem:[#allocation13] sm:$0xff] %v668_v16 }
 0x271   :  { %1017 = shalt.err (!%p1014_p10)
}
 0x272   :  { %s1018_s14 = scalar_lea.hbm %s1192_s6, 128 }
 0x273   :  { %p1019_p11 = scmp.ne.s32.totalorder %s1192_s6, %s1018_s14  ;;  %p1022_p12 = scmp.lt.u32.totalorder %s1018_s14, %s1192_s6 }
 0x275   :  { %p1024_p13 = pnand %p1022_p12, %p1019_p11 }
 0x277   :  { %1027 = shalt.err (!%p1024_p13)
}
 0x278   :  { %679 = dma.vmem_to_hbm [thread:$0]  %s677_s3, 128, %s1192_s6, [#allocation4]  }
 0x279   :  { %1036 = dma.done.wait [#allocation4], 128  }
 0x27a   :  { %1037 = vsyncadd [#allocation4], 4294967168 }
 0x27b   :  { %683 = vsyncpa [#allocation3], 1 }
 0x27c   :  { %684 = vsyncpa [#allocation6], 1 }
 0x27d   :  { %685 = vsyncpa [#allocation9], 1 }
 0x27e   :  { %686 = vsyncpa [#allocation12], 1 }
 0x27f   :  { %687 = vsyncpa [#allocation4], 1 }

</bundles_post_ra>
